<compile_context>
chip_gen: v7x
topology: tpu7x:2x2x1
jax: 0.10.0
libtpu: 0.0.40
codegen_flags: <defaults>
</compile_context>

<pallas_src>
import functools

import jax
import jax.numpy as jnp
from jax.experimental import pallas as pl
from jax.experimental.pallas import tpu as pltpu


_MASK_NEG = -1000000000.0   # same constant the PyTorch module uses


# ----------------------------------------------------------------------------
# Kernels
# ----------------------------------------------------------------------------
def _sdpa_single_kernel(*refs, inv_temperature, has_mask, mask_is_binary,
                        return_attn, pack_out, matmul_dtype):
    """Single pass over the full key axis (Lk resident in VMEM)."""
    if has_mask:
        q_ref, k_ref, v_ref, m_ref = refs[:4]
        out_refs = refs[4:]
    else:
        q_ref, k_ref, v_ref = refs[:3]
        m_ref = None
        out_refs = refs[3:]
    out_ref = out_refs[0]
    attn_ref = out_refs[1] if return_attn else None

    q = q_ref[0]          # (G, TQ, D)
    k = k_ref[0]          # (G, Lk, D)
    v = v_ref[0]          # (G, Lk, Dv)
    if matmul_dtype is not None:
        q = q.astype(matmul_dtype)
        k = k.astype(matmul_dtype)
        v = v.astype(matmul_dtype)

    # scores = (q / temperature) @ k^T, contracting head_dim, f32 accumulation.
    scores = jnp.einsum("gqd,gkd->gqk", q * inv_temperature, k,
                        preferred_element_type=jnp.float32)

    if m_ref is not None:
        m = m_ref[0].astype(jnp.float32)          # (1 or G, TQ, Lk)
        if mask_is_binary:
            m = (1.0 - m) * _MASK_NEG             # same transform as the module
        scores = scores + m                       # broadcasts over G if per-batch

    # Numerically stable softmax over the key axis (f32).
    smax = jnp.max(scores, axis=-1, keepdims=True)
    e = jnp.exp(scores - smax)
    denom = jnp.sum(e, axis=-1, keepdims=True)    # (G, TQ, 1), >= 1

    # TODO(synk): training-mode dropout not implemented (module in .eval()).
    if return_attn:
        attn = e / denom                          # exact divide for the returned probs
        attn_ref[0] = attn.astype(attn_ref.dtype)
        out = jnp.einsum("gqk,gkd->gqd", attn.astype(v.dtype), v,
                         preferred_element_type=jnp.float32)
    else:
        # Deferred normalization: matmul the un-normalized exp and scale the
        # small (G,TQ,Dv) result instead of the big (G,TQ,Lk) matrix.
        out = jnp.einsum("gqk,gkd->gqd", e.astype(v.dtype), v,
                         preferred_element_type=jnp.float32)
        out = out * pl.reciprocal(denom, approx=True)     # EUP slot

    if pack_out:
        G = out.shape[0]
        packed = jnp.concatenate([out[g] for g in range(G)], axis=-1)  # (TQ, G*Dv)
        out_ref[0, 0] = packed.astype(out_ref.dtype)
    else:
        out_ref[0] = out.astype(out_ref.dtype)


def _sdpa_flash_kernel(*refs, inv_temperature, has_mask, mask_is_binary,
                       pack_out, matmul_dtype):
    """Lk-tiled online-softmax path (output only, no materialized probabilities)."""
    if has_mask:
        q_ref, k_ref, v_ref, m_ref, out_ref, m_sc, l_sc, acc_sc = refs
    else:
        q_ref, k_ref, v_ref, out_ref, m_sc, l_sc, acc_sc = refs
        m_ref = None

    ki = pl.program_id(3)

    @pl.when(ki == 0)
    def _():
        m_sc[...] = jnp.full(m_sc.shape, -jnp.inf, dtype=m_sc.dtype)
        l_sc[...] = jnp.zeros(l_sc.shape, l_sc.dtype)
        acc_sc[...] = jnp.zeros(acc_sc.shape, acc_sc.dtype)

    q = q_ref[0]          # (G, TQ, D)
    k = k_ref[0]          # (G, TK, D)
    v = v_ref[0]          # (G, TK, Dv)
    if matmul_dtype is not None:
        q = q.astype(matmul_dtype)
        k = k.astype(matmul_dtype)
        v = v.astype(matmul_dtype)

    s = jnp.einsum("gqd,gkd->gqk", q * inv_temperature, k,
                   preferred_element_type=jnp.float32)
    if m_ref is not None:
        m = m_ref[0].astype(jnp.float32)
        if mask_is_binary:
            m = (1.0 - m) * _MASK_NEG
        s = s + m

    m_prev = m_sc[...]
    m_new = jnp.maximum(m_prev, jnp.max(s, axis=-1, keepdims=True))
    alpha = jnp.exp(m_prev - m_new)               # 0 at ki == 0 (m_prev = -inf)
    p = jnp.exp(s - m_new)
    l_sc[...] = alpha * l_sc[...] + jnp.sum(p, axis=-1, keepdims=True)
    acc_sc[...] = alpha * acc_sc[...] + jnp.einsum(
        "gqk,gkd->gqd", p.astype(v.dtype), v, preferred_element_type=jnp.float32)
    m_sc[...] = m_new

    # TODO(synk): training-mode dropout not implemented (module in .eval()).
    @pl.when(ki == pl.num_programs(3) - 1)
    def _():
        out = acc_sc[...] * pl.reciprocal(l_sc[...], approx=True)
        if pack_out:
            G = out.shape[0]
            packed = jnp.concatenate([out[g] for g in range(G)], axis=-1)
            out_ref[0, 0] = packed.astype(out_ref.dtype)
        else:
            out_ref[0] = out.astype(out_ref.dtype)


# ----------------------------------------------------------------------------
# Tiling / VMEM planning
# ----------------------------------------------------------------------------
def _largest_divisor_leq(n, cap):
    for g in range(min(n, cap), 0, -1):
        if n % g == 0:
            return g
    return 1


def _divisor_tiles(n, preferred):
    tiles = {t for t in preferred if 0 < t <= n and n % t == 0}
    tiles.add(n)               # full extent is always legal
    return sorted(tiles, reverse=True)


def _phys_vmem_bytes():
    try:
        info = pltpu.get_tpu_info()
        cap = getattr(info, "vmem_capacity_bytes", None)
        if cap:
            return int(cap)
    except Exception:
        pass
    return 64 << 20            # conservative default: v7x per-TensorCore VMEM


def _single_step_bytes(G, TQ, Lk, D, Dv, itemsize, mask_bytes, mask_per_head,
                       return_attn):
    # DMA'd blocks (double-buffered by the Pallas pipeline).
    dma = G * (TQ * D + Lk * D + Lk * Dv + TQ * Dv) * itemsize
    if return_attn:
        dma += G * TQ * Lk * itemsize
    if mask_bytes:
        dma += (G if mask_per_head else 1) * TQ * Lk * mask_bytes
    # f32 softmax intermediates (scores, exp, probs) + f32 output accumulation.
    inter = 3 * G * TQ * Lk * 4 + 2 * G * TQ * Dv * 4
    return 2 * dma + inter


def _flash_step_bytes(G, TQ, TK, D, Dv, itemsize, mask_bytes, mask_per_head):
    dma = G * (TQ * D + TK * D + TK * Dv + TQ * Dv) * itemsize
    if mask_bytes:
        dma += (G if mask_per_head else 1) * TQ * TK * mask_bytes
    inter = 3 * G * TQ * TK * 4 + 2 * G * TQ * Dv * 4
    scratch = G * TQ * (Dv + 2) * 4
    return 2 * dma + inter + scratch


def _plan_tiles(H, Lq, Lk, D, Dv, itemsize, mask_bytes, mask_per_head,
                return_attn, budget, force_flash=False, flash_kv_block=None):
    """Returns (mode, G, TQ, TK): mode is "single" (full Lk) or "flash" (Lk tiled)."""
    # Pack heads only when the per-head tile is tiny (amortize ~0.35us/step).
    g0 = _largest_divisor_leq(H, 8) if Lq * Lk <= 128 * 1024 else 1
    g_candidates = sorted({d for d in (g0, 4, 2, 1) if 1 <= d <= g0 and H % d == 0},
                          reverse=True)
    # Bias TQ toward MXU-friendly 512/256/128 multiples (full Lq if it divides).
    tq_candidates = _divisor_tiles(Lq, (1024, 512, 256, 128))

    if not force_flash:
        for g in g_candidates:
            for tq in tq_candidates:
                if _single_step_bytes(g, tq, Lk, D, Dv, itemsize, mask_bytes,
                                      mask_per_head, return_attn) <= budget:
                    return "single", g, tq, Lk

    if force_flash or not return_attn:
        if flash_kv_block is not None:
            assert Lk % flash_kv_block == 0, "flash_kv_block must divide Lk"
            tk_candidates = [flash_kv_block]
        else:
            tk_candidates = _divisor_tiles(Lk, (512, 256, 128))
        for g in g_candidates:
            for tq in tq_candidates:
                for tk in tk_candidates:
                    if _flash_step_bytes(g, tq, tk, D, Dv, itemsize, mask_bytes,
                                         mask_per_head) <= budget:
                        return "flash", g, tq, tk
        tq_small = _divisor_tiles(Lq, (128, 64, 32, 16, 8))
        tk_small = (tk_candidates if flash_kv_block is not None
                    else _divisor_tiles(Lk, (256, 128, 64, 32, 16, 8)))
        return "flash", 1, tq_small[-1], tk_small[-1]

    # return_attn=True and nothing fits: the B*H*Lq*Lk attn output has to be
    # materialized anyway — take the smallest single-pass footprint (G=1, tiny
    # TQ) and rely on the (physically-clamped) vmem limit.
    tq_small = _divisor_tiles(Lq, (128, 64, 32, 16, 8))
    return "single", 1, tq_small[-1], Lk


def _vmem_limit_bytes(step_bytes, phys):
    need = step_bytes + (4 << 20)                      # headroom
    lo = min(32 << 20, phys // 2)
    hi = max(lo, int(phys * 0.9))                      # never above physical VMEM
    return int(max(lo, min(hi, need)))


# ----------------------------------------------------------------------------
# Wrapper
# ----------------------------------------------------------------------------
def scaled_dot_product_attention(q, k, v, temperature, mask=None,
                                 return_attn=True, matmul_in_bf16=False,
                                 force_flash=False, flash_kv_block=None):
    """q: (B,H,Lq,D), k: (B,H,Lk,D), v: (B,H,Lk,Dv).

    mask: None | (B,Lq,Lk) 0/1 mask (transformed to additive, as in the module)
          | (B,1|H,Lq,Lk) additive mask (used as-is, matching PyTorch for 4-D).

    Returns (output, attn) like the PyTorch module. PERFORMANCE NOTE: pass
    return_attn=False whenever the probabilities are not needed — the attn
    output is an O(B*H*Lq*Lk) HBM write stream that dominates all other traffic
    and it also forces the full-Lk single-pass path (no Lk tiling).

    matmul_in_bf16=True casts f32 q/k/v to bf16 for the two matmuls (f32
    accumulation and f32 softmax are kept) — a large MXU-side win on v5e/v6e.
    force_flash/flash_kv_block are test/tuning hooks for the Lk-tiled path.
    """
    B, H, Lq, D = q.shape
    Lk = k.shape[2]
    Dv = v.shape[3]
    out_dtype = q.dtype

    if force_flash and return_attn:
        raise ValueError("force_flash requires return_attn=False (the flash path "
                         "never materializes the probability matrix)")

    has_mask = mask is not None
    mask_is_binary = False
    m4 = None
    Hm = 1
    mask_bytes = 0
    if has_mask:
        if mask.ndim == 3:
            assert mask.shape == (B, Lq, Lk)
            mask_is_binary = True
            m4 = mask.reshape(B, 1, Lq, Lk).astype(jnp.bfloat16)   # exact for 0/1
        elif mask.ndim == 4:
            assert mask.shape[0] == B and mask.shape[2:] == (Lq, Lk)
            assert mask.shape[1] in (1, H)
            m4 = mask                                              # additive, as-is
        else:
            raise ValueError("mask must be 3-D or 4-D")
        Hm = m4.shape[1]
        mask_bytes = jnp.dtype(m4.dtype).itemsize

    itemsize = jnp.dtype(q.dtype).itemsize
    phys = _phys_vmem_bytes()
    budget = max(8 << 20, int(0.30 * phys))   # generation-aware: ~19 MiB (v7x), ~38 MiB (v5e/v6e)

    mode, G, TQ, TK = _plan_tiles(H, Lq, Lk, D, Dv, itemsize, mask_bytes, Hm != 1,
                                  return_attn, budget, force_flash, flash_kv_block)

    matmul_dtype = jnp.bfloat16 if (matmul_in_bf16 and q.dtype == jnp.float32) else None
    # Lane-dense output: pack the G heads along lanes when Dv is lane-sparse.
    pack_out = (Dv % 128 != 0) and (G > 1)
    out_arr_shape = (B, H // G, Lq, G * Dv) if pack_out else (B, H, Lq, Dv)
    inv_temperature = 1.0 / float(temperature)

    if mode == "single":
        step_bytes = _single_step_bytes(G, TQ, Lk, D, Dv, itemsize, mask_bytes,
                                        Hm != 1, return_attn)
        # NOTE: keep the Lq axis innermost — the K/V index_maps ignore `qi`, so
        # the (G,Lk,D)/(G,Lk,Dv) blocks are NOT re-DMA'd across query tiles.
        grid = (B, H // G, Lq // TQ)
        in_specs = [
            pl.BlockSpec((1, G, TQ, D), lambda b, hg, qi: (b, hg, qi, 0)),
            pl.BlockSpec((1, G, Lk, D), lambda b, hg, qi: (b, hg, 0, 0)),
            pl.BlockSpec((1, G, Lk, Dv), lambda b, hg, qi: (b, hg, 0, 0)),
        ]
        inputs = [q, k, v]
        if has_mask:
            if Hm == 1:   # broadcast over heads purely via the index_map
                in_specs.append(pl.BlockSpec((1, 1, TQ, Lk), lambda b, hg, qi: (b, 0, qi, 0)))
            else:
                in_specs.append(pl.BlockSpec((1, G, TQ, Lk), lambda b, hg, qi: (b, hg, qi, 0)))
            inputs.append(m4)

        if pack_out:
            out_spec_o = pl.BlockSpec((1, 1, TQ, G * Dv), lambda b, hg, qi: (b, hg, qi, 0))
        else:
            out_spec_o = pl.BlockSpec((1, G, TQ, Dv), lambda b, hg, qi: (b, hg, qi, 0))

        if return_attn:
            out_shape = (jax.ShapeDtypeStruct(out_arr_shape, out_dtype),
                         jax.ShapeDtypeStruct((B, H, Lq, Lk), out_dtype))
            out_specs = (out_spec_o,
                         pl.BlockSpec((1, G, TQ, Lk), lambda b, hg, qi: (b, hg, qi, 0)))
        else:
            out_shape = jax.ShapeDtypeStruct(out_arr_shape, out_dtype)
            out_specs = out_spec_o

        kernel = functools.partial(
            _sdpa_single_kernel, inv_temperature=inv_temperature, has_mask=has_mask,
            mask_is_binary=mask_is_binary, return_attn=return_attn,
            pack_out=pack_out, matmul_dtype=matmul_dtype)

        result = pl.pallas_call(
            kernel, out_shape=out_shape,
            grid_spec=pltpu.PrefetchScalarGridSpec(
                num_scalar_prefetch=0, grid=grid,
                in_specs=in_specs, out_specs=out_specs),
            compiler_params=pltpu.CompilerParams(
                dimension_semantics=("parallel", "parallel", "parallel"),
                vmem_limit_bytes=_vmem_limit_bytes(step_bytes, phys)),
        )(*inputs)
    else:
        step_bytes = _flash_step_bytes(G, TQ, TK, D, Dv, itemsize, mask_bytes, Hm != 1)
        grid = (B, H // G, Lq // TQ, Lk // TK)
        in_specs = [
            pl.BlockSpec((1, G, TQ, D), lambda b, hg, qi, ki: (b, hg, qi, 0)),
            pl.BlockSpec((1, G, TK, D), lambda b, hg, qi, ki: (b, hg, ki, 0)),
            pl.BlockSpec((1, G, TK, Dv), lambda b, hg, qi, ki: (b, hg, ki, 0)),
        ]
        inputs = [q, k, v]
        if has_mask:
            if Hm == 1:
                in_specs.append(pl.BlockSpec((1, 1, TQ, TK), lambda b, hg, qi, ki: (b, 0, qi, ki)))
            else:
                in_specs.append(pl.BlockSpec((1, G, TQ, TK), lambda b, hg, qi, ki: (b, hg, qi, ki)))
            inputs.append(m4)

        if pack_out:
            out_specs = pl.BlockSpec((1, 1, TQ, G * Dv), lambda b, hg, qi, ki: (b, hg, qi, 0))
        else:
            out_specs = pl.BlockSpec((1, G, TQ, Dv), lambda b, hg, qi, ki: (b, hg, qi, 0))
        out_shape = jax.ShapeDtypeStruct(out_arr_shape, out_dtype)

        kernel = functools.partial(
            _sdpa_flash_kernel, inv_temperature=inv_temperature, has_mask=has_mask,
            mask_is_binary=mask_is_binary, pack_out=pack_out, matmul_dtype=matmul_dtype)

        result = pl.pallas_call(
            kernel, out_shape=out_shape,
            grid_spec=pltpu.PrefetchScalarGridSpec(
                num_scalar_prefetch=0, grid=grid,
                in_specs=in_specs, out_specs=out_specs,
                scratch_shapes=[pltpu.VMEM((G, TQ, 1), jnp.float32),
                                pltpu.VMEM((G, TQ, 1), jnp.float32),
                                pltpu.VMEM((G, TQ, Dv), jnp.float32)]),
            compiler_params=pltpu.CompilerParams(
                dimension_semantics=("parallel", "parallel", "parallel", "arbitrary"),
                vmem_limit_bytes=_vmem_limit_bytes(step_bytes, phys)),
        )(*inputs)

    if return_attn:
        out, attn = result
    else:
        out, attn = result, None

    if pack_out:
        # Un-pack the lane-dense (B, H//G, Lq, G*Dv) slab back to (B, H, Lq, Dv).
        out = out.reshape(B, H // G, Lq, G, Dv)
        out = jnp.swapaxes(out, 2, 3).reshape(B, H, Lq, Dv)

    if return_attn:
        return out, attn
    return out


# ----------------------------------------------------------------------------
# Reference + tests
# ----------------------------------------------------------------------------
def _reference(q, k, v, temperature, mask=None):
    attn = jnp.einsum("bhqd,bhkd->bhqk", q / temperature, k)
    if mask is not None and mask.ndim == 3:
        mask = (1.0 - mask.astype(jnp.float32))[:, None, :, :] * -1e9
    if mask is not None:
        attn = attn + mask
    attn = jax.nn.softmax(attn, axis=-1)
    out = jnp.einsum("bhqk,bhkd->bhqd", attn, v)
    return out, attn


if __name__ == "__main__":
    key = jax.random.PRNGKey(0)
    B, H, Lq, Lk, D, Dv = 2, 2, 8, 8, 32, 32
    temperature = float(D) ** 0.5

    kq, kk, kv, km = jax.random.split(key, 4)
    q = jax.random.normal(kq, (B, H, Lq, D), dtype=jnp.float32)
    k = jax.random.normal(kk, (B, H, Lk, D), dtype=jnp.float32)
    v = jax.random.normal(kv, (B, H, Lk, Dv), dtype=jnp.float32)
    mask = (jax.random.uniform(km, (B, Lq, Lk)) > 0.2).astype(jnp.float32)

    ATOL = RTOL = 1e-2
    ref_out, ref_attn = _reference(q, k, v, temperature, mask=mask)
    ref_out_nm, ref_attn_nm = _reference(q, k, v, temperature, mask=None)

    # 1) masked, (output, attn): single-pass path, exact probs, lane-packed store
    out, attn = scaled_dot_product_attention(q, k, v, temperature, mask=mask)
    jax.block_until_ready((out, attn))
    assert jnp.allclose(out, ref_out, atol=ATOL, rtol=RTOL)
    assert jnp.allclose(attn, ref_attn, atol=ATOL, rtol=RTOL)

    # 2) mask=None: separate compiled variant with no mask DMA at all
    out2, attn2 = scaled_dot_product_attention(q, k, v, temperature, mask=None)
    jax.block_until_ready((out2, attn2))
    assert jnp.allclose(out2, ref_out_nm, atol=ATOL, rtol=RTOL)
    assert jnp.allclose(attn2, ref_attn_nm, atol=ATOL, rtol=RTOL)

    # 3) output only: deferred softmax normalization, no attn HBM write stream
    out3 = scaled_dot_product_attention(q, k, v, temperature, mask=mask,
                                        return_attn=False)
    jax.block_until_ready(out3)
    assert jnp.allclose(out3, ref_out, atol=ATOL, rtol=RTOL)

    # 4) H=1 exercises the un-packed (G=1) output store path
    out4, attn4 = scaled_dot_product_attention(q[:, :1], k[:, :1], v[:, :1],
                                               temperature, mask=mask)
    jax.block_until_ready((out4, attn4))
    r_out4, r_attn4 = _reference(q[:, :1], k[:, :1], v[:, :1], temperature, mask=mask)
    assert jnp.allclose(out4, r_out4, atol=ATOL, rtol=RTOL)
    assert jnp.allclose(attn4, r_attn4, atol=ATOL, rtol=RTOL)

    # 5) bf16 MXU operands (opt-in matmul speedup for f32 inputs on v5e/v6e)
    out5 = scaled_dot_product_attention(q, k, v, temperature, mask=mask,
                                        return_attn=False, matmul_in_bf16=True)
    jax.block_until_ready(out5)
    assert jnp.allclose(out5, ref_out, atol=5e-2, rtol=5e-2)

    # 6) Lk-tiled online-softmax (flash) path, forced at a small shape
    B2, H2, Lq2, Lk2, D2 = 1, 2, 128, 256, 32
    k1, k2, k3, k4 = jax.random.split(jax.random.PRNGKey(1), 4)
    q2 = jax.random.normal(k1, (B2, H2, Lq2, D2), dtype=jnp.float32)
    kk2 = jax.random.normal(k2, (B2, H2, Lk2, D2), dtype=jnp.float32)
    vv2 = jax.random.normal(k3, (B2, H2, Lk2, D2), dtype=jnp.float32)
    mask2 = (jax.random.uniform(k4, (B2, Lq2, Lk2)) > 0.3).astype(jnp.float32)
    out6 = scaled_dot_product_attention(q2, kk2, vv2, float(D2) ** 0.5, mask=mask2,
                                        return_attn=False, force_flash=True,
                                        flash_kv_block=128)
    jax.block_until_ready(out6)
    r_out6, _ = _reference(q2, kk2, vv2, float(D2) ** 0.5, mask=mask2)
    assert jnp.allclose(out6, r_out6, atol=ATOL, rtol=RTOL)

    print("KERNEL_OK")
</pallas_src>

<mosaic_0001>
module attributes {stable_mosaic.version = 11 : i64} {
  func.func @_sdpa_single_kernel(%arg0: i32, %arg1: i32, %arg2: i32, %arg3: memref<1x2x8x32xf32, #tpu.memory_space<vmem>>, %arg4: memref<1x2x8x32xf32, #tpu.memory_space<vmem>>, %arg5: memref<1x2x8x32xf32, #tpu.memory_space<vmem>>, %arg6: memref<1x1x8x8xbf16, #tpu.memory_space<vmem>>, %arg7: memref<1x1x8x64xf32, #tpu.memory_space<vmem>>, %arg8: memref<1x2x8x8xf32, #tpu.memory_space<vmem>>) attributes {dimension_semantics = [#tpu.dimension_semantics<parallel>, #tpu.dimension_semantics<parallel>, #tpu.dimension_semantics<parallel>], iteration_bounds = array<i64: 2, 1, 1>, scalar_prefetch = 0 : i64, scratch_operands = 0 : i64, tpu.core_type = #tpu.core_type<tc>, window_params = [{transform_indices = @transform_0, window_bounds = array<i64: 1, 2, 8, 32>}, {transform_indices = @transform_1, window_bounds = array<i64: 1, 2, 8, 32>}, {transform_indices = @transform_2, window_bounds = array<i64: 1, 2, 8, 32>}, {transform_indices = @transform_3, window_bounds = array<i64: 1, 1, 8, 8>}, {transform_indices = @transform_4, window_bounds = array<i64: 1, 1, 8, 64>}, {transform_indices = @transform_5, window_bounds = array<i64: 1, 2, 8, 8>}]} {
    %c0 = arith.constant 0 : index
    %c0_0 = arith.constant 0 : index
    %c0_1 = arith.constant 0 : index
    %c0_2 = arith.constant 0 : index
    %0 = vector.load %arg3[%c0, %c0_0, %c0_1, %c0_2] : memref<1x2x8x32xf32, #tpu.memory_space<vmem>>, vector<1x2x8x32xf32>
    %1 = vector.shape_cast %0 : vector<1x2x8x32xf32> to vector<2x8x32xf32>
    %c0_3 = arith.constant 0 : index
    %c0_4 = arith.constant 0 : index
    %c0_5 = arith.constant 0 : index
    %c0_6 = arith.constant 0 : index
    %2 = vector.load %arg4[%c0_3, %c0_4, %c0_5, %c0_6] : memref<1x2x8x32xf32, #tpu.memory_space<vmem>>, vector<1x2x8x32xf32>
    %3 = vector.shape_cast %2 : vector<1x2x8x32xf32> to vector<2x8x32xf32>
    %c0_7 = arith.constant 0 : index
    %c0_8 = arith.constant 0 : index
    %c0_9 = arith.constant 0 : index
    %c0_10 = arith.constant 0 : index
    %4 = vector.load %arg5[%c0_7, %c0_8, %c0_9, %c0_10] : memref<1x2x8x32xf32, #tpu.memory_space<vmem>>, vector<1x2x8x32xf32>
    %5 = vector.shape_cast %4 : vector<1x2x8x32xf32> to vector<2x8x32xf32>
    %cst = arith.constant 0.176776692 : f32
    %6 = vector.broadcast %cst : f32 to vector<2x8x32xf32>
    %7 = arith.mulf %1, %6 : vector<2x8x32xf32>
    "tpu.trace_start"() <{level = 10 : i32, message = "gqd,gkd->gqk"}> : () -> ()
    %cst_11 = arith.constant dense<0.000000e+00> : vector<2x8x8xf32>
    %8 = tpu.matmul %7, %3, %cst_11 {dimension_numbers = #tpu.dot_dimension_numbers<[2], [2], [1], [1], [0, 0, 0, 1, 1, 1], [0], [0]>} : vector<2x8x32xf32>, vector<2x8x32xf32>, vector<2x8x8xf32> -> vector<2x8x8xf32>
    "tpu.trace_stop"() : () -> ()
    %c0_12 = arith.constant 0 : index
    %c0_13 = arith.constant 0 : index
    %c0_14 = arith.constant 0 : index
    %c0_15 = arith.constant 0 : index
    %9 = vector.load %arg6[%c0_12, %c0_13, %c0_14, %c0_15] : memref<1x1x8x8xbf16, #tpu.memory_space<vmem>>, vector<1x1x8x8xbf16>
    %10 = vector.shape_cast %9 : vector<1x1x8x8xbf16> to vector<1x8x8xbf16>
    %11 = arith.extf %10 : vector<1x8x8xbf16> to vector<1x8x8xf32>
    %cst_16 = arith.constant 1.000000e+00 : f32
    %12 = vector.broadcast %cst_16 : f32 to vector<1x8x8xf32>
    %13 = arith.subf %12, %11 : vector<1x8x8xf32>
    %cst_17 = arith.constant -1.000000e+09 : f32
    %14 = vector.broadcast %cst_17 : f32 to vector<1x8x8xf32>
    %15 = arith.mulf %13, %14 : vector<1x8x8xf32>
    %16 = vector.broadcast %15 : vector<1x8x8xf32> to vector<2x8x8xf32>
    %17 = arith.addf %8, %16 : vector<2x8x8xf32>
    %cst_18 = arith.constant dense<0xFF800000> : vector<2x8xf32>
    %18 = vector.multi_reduction <maximumf>, %17, %cst_18 [2] : vector<2x8x8xf32> to vector<2x8xf32>
    %19 = vector.shape_cast %18 : vector<2x8xf32> to vector<2x8x1xf32>
    %20 = vector.broadcast %19 : vector<2x8x1xf32> to vector<2x8x8xf32>
    %21 = arith.subf %17, %20 : vector<2x8x8xf32>
    %22 = math.exp %21 : vector<2x8x8xf32>
    %cst_19 = arith.constant dense<0.000000e+00> : vector<2x8xf32>
    %23 = vector.multi_reduction <add>, %22, %cst_19 [2] : vector<2x8x8xf32> to vector<2x8xf32>
    %24 = vector.shape_cast %23 : vector<2x8xf32> to vector<2x8x1xf32>
    %25 = vector.broadcast %24 : vector<2x8x1xf32> to vector<2x8x8xf32>
    %26 = arith.divf %22, %25 : vector<2x8x8xf32>
    %c0_20 = arith.constant 0 : index
    %c0_21 = arith.constant 0 : index
    %c0_22 = arith.constant 0 : index
    %c0_23 = arith.constant 0 : index
    %27 = vector.load %arg8[%c0_20, %c0_21, %c0_22, %c0_23] : memref<1x2x8x8xf32, #tpu.memory_space<vmem>>, vector<1x2x8x8xf32>
    %28 = vector.shape_cast %27 : vector<1x2x8x8xf32> to vector<2x8x8xf32>
    %29 = vector.shape_cast %26 : vector<2x8x8xf32> to vector<1x2x8x8xf32>
    tpu.vector_store %arg8[%c0_20, %c0_21, %c0_22, %c0_23], %29 {strides = array<i32>} : memref<1x2x8x8xf32, #tpu.memory_space<vmem>>, vector<1x2x8x8xf32>,
    "tpu.trace_start"() <{level = 10 : i32, message = "gqk,gkd->gqd"}> : () -> ()
    %cst_24 = arith.constant dense<0.000000e+00> : vector<2x8x32xf32>
    %30 = tpu.matmul %26, %5, %cst_24 {dimension_numbers = #tpu.dot_dimension_numbers<[2], [1], [1], [2], [0, 0, 0, 1, 1, 2], [0], [0]>} : vector<2x8x8xf32>, vector<2x8x32xf32>, vector<2x8x32xf32> -> vector<2x8x32xf32>
    "tpu.trace_stop"() : () -> ()
    %31 = vector.extract_strided_slice %30 {offsets = [0, 0, 0], sizes = [1, 8, 32], strides = [1, 1, 1]} : vector<2x8x32xf32> to vector<1x8x32xf32>
    %32 = vector.shape_cast %31 : vector<1x8x32xf32> to vector<8x32xf32>
    %33 = vector.extract_strided_slice %30 {offsets = [1, 0, 0], sizes = [1, 8, 32], strides = [1, 1, 1]} : vector<2x8x32xf32> to vector<1x8x32xf32>
    %34 = vector.shape_cast %33 : vector<1x8x32xf32> to vector<8x32xf32>
    %35 = tpu.concatenate %32, %34 in 1 : vector<8x32xf32>, vector<8x32xf32> -> vector<8x64xf32>
    %c0_25 = arith.constant 0 : index
    %c0_26 = arith.constant 0 : index
    %c0_27 = arith.constant 0 : index
    %c0_28 = arith.constant 0 : index
    %36 = vector.load %arg7[%c0_25, %c0_26, %c0_27, %c0_28] : memref<1x1x8x64xf32, #tpu.memory_space<vmem>>, vector<1x1x8x64xf32>
    %37 = vector.shape_cast %36 : vector<1x1x8x64xf32> to vector<8x64xf32>
    %38 = vector.shape_cast %35 : vector<8x64xf32> to vector<1x1x8x64xf32>
    tpu.vector_store %arg7[%c0_25, %c0_26, %c0_27, %c0_28], %38 {strides = array<i32>} : memref<1x1x8x64xf32, #tpu.memory_space<vmem>>, vector<1x1x8x64xf32>,
    return
  }
  func.func @transform_0(%arg0: i32, %arg1: i32, %arg2: i32) -> (i32, i32, i32, i32) {
    %c0_i32 = arith.constant 0 : i32
    %c0_i32_0 = arith.constant 0 : i32
    return %arg0, %arg1, %arg2, %c0_i32 : i32, i32, i32, i32
  }
  func.func @transform_1(%arg0: i32, %arg1: i32, %arg2: i32) -> (i32, i32, i32, i32) {
    %c0_i32 = arith.constant 0 : i32
    %c0_i32_0 = arith.constant 0 : i32
    %c0_i32_1 = arith.constant 0 : i32
    return %arg0, %arg1, %c0_i32, %c0_i32_0 : i32, i32, i32, i32
  }
  func.func @transform_2(%arg0: i32, %arg1: i32, %arg2: i32) -> (i32, i32, i32, i32) {
    %c0_i32 = arith.constant 0 : i32
    %c0_i32_0 = arith.constant 0 : i32
    %c0_i32_1 = arith.constant 0 : i32
    return %arg0, %arg1, %c0_i32, %c0_i32_0 : i32, i32, i32, i32
  }
  func.func @transform_3(%arg0: i32, %arg1: i32, %arg2: i32) -> (i32, i32, i32, i32) {
    %c0_i32 = arith.constant 0 : i32
    %c0_i32_0 = arith.constant 0 : i32
    %c0_i32_1 = arith.constant 0 : i32
    return %arg0, %c0_i32, %arg2, %c0_i32_0 : i32, i32, i32, i32
  }
  func.func @transform_4(%arg0: i32, %arg1: i32, %arg2: i32) -> (i32, i32, i32, i32) {
    %c0_i32 = arith.constant 0 : i32
    %c0_i32_0 = arith.constant 0 : i32
    return %arg0, %arg1, %arg2, %c0_i32 : i32, i32, i32, i32
  }
  func.func @transform_5(%arg0: i32, %arg1: i32, %arg2: i32) -> (i32, i32, i32, i32) {
    %c0_i32 = arith.constant 0 : i32
    %c0_i32_0 = arith.constant 0 : i32
    return %arg0, %arg1, %arg2, %c0_i32 : i32, i32, i32, i32
  }
}

</mosaic_0001>

<bundles_post_ra>
// kernel: tpu_custom_call.1
= control target key start
LH: loop header
LB: loop body
LE: loop exit
PB: predicated region body
PF: predicated region fallthrough
CT: control target
= control target key end

     0   :  { %s1721_s0 = inlined_call_operand.hbm [shape: f32[2,2,8,32], index: 0, kind: input, shape index: {}]   ;;  %s1722_s1 = inlined_call_operand.hbm [shape: f32[2,2,8,32], index: 1, kind: input, shape index: {}]   ;;  %s1723_s2 = inlined_call_operand.hbm [shape: f32[2,2,8,32], index: 2, kind: input, shape index: {}]   ;;  %s1724_s3 = inlined_call_operand.vmem [shape: bf16[2,1,8,8], index: 3, kind: input, shape index: {}]   ;;  %s1725_s4 = inlined_call_operand.hbm [shape: f32[2,1,8,64], index: 4, kind: output, shape index: {0}]   ;;  %s1726_s5 = inlined_call_operand.hbm [shape: f32[2,2,8,8], index: 5, kind: output, shape index: {1}]  }
   0x1   :  { %1739 = sst [smem:[#allocation20_spill]] %s1722_s1 }
   0x2   :  { %11 = vsyncpa [#allocation3], 0 }
   0x3   :  { %13 = vsyncpa [#allocation3 + $0x1], 0 }
   0x4   :  { %14 = vsyncpa [#allocation6], 0 }
   0x5   :  { %16 = vsyncpa [#allocation6 + $0x1], 0 }
   0x6   :  { %17 = vsyncpa [#allocation4], 0 }
   0x7   :  { %19 = vsyncpa [#allocation4 + $0x1], 0 }
   0x8   :  { %20 = vsyncpa [#allocation10], 0 }
   0x9   :  { %22 = vsyncpa [#allocation10 + $0x1], 0  ;;  %s1384_s18 = smov 0   ;;  %s1386_s19 = smov 0  }
   0xa   :  { %s1388_s20 = smov 0   ;;  %s1390_s21 = smov 0  }
   0xb   :  { %s1392_s22 = smov 0   ;;  %s1394_s23 = smov 0  }
   0xc LB: > { %1740 = sst [smem:[#allocation15_spill]] %s1336_s22  ;;  %s1415_s24 = sadd.s32 4294967295, %s1340_s23   ;;  %s1340_s23 = sphi %s1394_s23, %s28_s23   ;;  %s1336_s22 = sphi %s1392_s22, %s1767_s22   ;;  %s1332_s21 = sphi %s1390_s21, %s1766_s21   ;;  %s1328_s20 = sphi %s1388_s20, %s1770_s20   ;;  %s1324_s19 = sphi %s1386_s19, %s1769_s19   ;;  %s1320_s18 = sphi %s1384_s18, %s1768_s18  }
   0xd   : > { %1741 = sst [smem:[#allocation16_spill]] %s1340_s23  ;;  %s976_s25 = sadd.s32 4294967294, %s1340_s23  }
   0xe   : > { %s47_s26 = sadd.s32 1, %s1336_s22  ;;  %s58_s27 = sadd.s32 1, %s1328_s20 }
   0xf   : > { %p49_p0 = scmp.ge.s32.totalorder %s47_s26, 2  ;;  %p65_p1 = scmp.ne.s32.totalorder %s1328_s20, %s1324_s19 }
  0x10   : > { %p66_p2 = scmp.eq.s32.totalorder %s1340_s23, 0  ;;  %p71_p3 = scmp.ne.s32.totalorder %s1324_s19, %s1320_s18 }
  0x11   : > { %s1772_s26 = smov (%p49_p0, %s47_s26), 0  ;;  %p72_p5 = scmp.eq.s32.totalorder %s1415_s24, 0 }
  0x12   : > { %1742 = sst [smem:[#allocation17_spill]] %s1772_s26  ;;  %p1427_p4 = por %p66_p2, %p65_p1 }
  0x13   : > { %s51_s29 = ssub.s32 %s1336_s22, %s1772_s26  ;;  %p183_p6 = scmp.eq.s32.totalorder %s1415_s24, 1 }
  0x14   : > { %p56_p7 = scmp.eq.s32.totalorder %s51_s29, 0  ;;  %p1435_p8 = por %p72_p5, %p71_p3 }
  0x15   : > { %p1439_p9 = por %p183_p6, %p65_p1  ;;  %p189_p10 = scmp.eq.s32.totalorder %s976_s25, 1 }
  0x16   : > { %s1744_s30 = scalar_select %p1435_p8, 1, 0 }
  0x17   : > { %s1745_s6 = scalar_select %p1439_p9, 1, 0 }
  0x18   : > { %s1444_s7 = scalar_select %p56_p7, %s1328_s20, %s58_s27  }
  0x19   : > { %p1446_p11 = por %p189_p10, %p71_p3  ;;  %p1067_p13 = scmp.lt.s32.totalorder %s1340_s23, 2 }
  0x1a   : > { %1746 = sst [smem:[#allocation18_spill]] %s1444_s7  ;;  %s1727_s9 = sand.u32 1, %s1328_s20  }
  0x1b   : > { %s1747_s8 = scalar_select %p1446_p11, 1, 0 }
  0x1c   : > { %s1455_s10 = sshll.u32 %s1727_s9, 4  ;;  %s1458_s11 = sshll.u32 %s1336_s22, 8 }
  0x1d   : > { %1748 = sst [smem:[#allocation19_spill]] %s1747_s8  ;;  %p1462_p0 = pnand %p1067_p13, %p1427_p4 }
  0x1e   : > { %s263_s13 = sand.u32 1, %s1340_s23   ;;  %s1750_s1 = sld [smem:[#allocation20_spill]] }
  0x1f   : > { %s267_s17 = scalar_lea.vmem [#allocation5], %s1455_s10  ;;  %s1478_s27 = scalar_lea.sflag [#allocation6], %s263_s13 }
  0x20   : > { %s276_s25 = sshll.u32 %s267_s17, 4  ;;  %p1484_p4 = pneg %p1462_p0  ;;  %s1475_s25 = int_to_ptr.vmem [resolvable:$true] %s276_s25 }
  0x24   : > { %s1471_s16 = scalar_lea.hbm %s1750_s1, %s1458_s11  ;;  %s1137_s17 = scalar_lea.hbm %s1750_s1, 512 }
  0x25   : > { %s1132_s28 = scalar_lea.hbm %s1471_s16, 256  ;;  %p1138_p7 = scmp.lt.u32.totalorder %s1471_s16, %s1750_s1 }
  0x26   : > { %p1133_p3 = scmp.ne.s32.totalorder %s1471_s16, %s1132_s28  ;;  %p1139_p10 = scmp.lt.u32.totalorder %s1137_s17, %s1132_s28 }
  0x27   : > { %p1141_p12 = scmp.lt.u32.totalorder %s1132_s28, %s1471_s16 }
  0x28   : > { %p1135_p5 = pnand %p1484_p4, %p1133_p3  ;;  %p1140_p13 = por %p1139_p10, %p1138_p7 }
  0x2a   : > { %p1136_p6 = pneg %p1135_p5  ;;  %p1142_p1 = por %p1141_p12, %p1140_p13 }
  0x2c   : > { %p1143_p2 = pnand %p1142_p1, %p1136_p6 }
  0x2e   : > { %1146 = shalt.err (!%p1143_p2)
}
  0x2f   : > { %s1147_s13 = scalar_lea.vmem %s1475_s25, 256  ;;  %s1342_s14 = smov [#allocation5]  }
  0x30   : > { %p1148_p3 = scmp.ne.s32.totalorder %s1475_s25, %s1147_s13  ;;  %s1152_s15 = sshll.u32 %s1342_s14, 4  ;;  %s1153_s15 = int_to_ptr.vmem [resolvable:$false] %s1152_s15 }
  0x31   : > { %s1154_s26 = scalar_lea.vmem %s1153_s15, 512  ;;  %p1155_p9 = scmp.lt.s32.totalorder %s1475_s25, %s1153_s15 }
  0x32   : > { %p1150_p5 = pnand %p1148_p3, %p1484_p4  ;;  %p1156_p8 = scmp.lt.s32.totalorder %s1154_s26, %s1147_s13 }
  0x34   : > { %p1151_p11 = pneg %p1150_p5  ;;  %p1157_p7 = por %p1156_p8, %p1155_p9 }
  0x36   : > { %p1158_p10 = pnand %p1157_p7, %p1151_p11 }
  0x38   : > { %1161 = shalt.err (!%p1158_p10)
}
  0x39   : > { %s1731_s9 = smov 128   ;;  %s1733_s28 = smov 8  }
  0x3a   : > { %1056 = dma.hbm_to_vmem [thread:$0]  (!%p1462_p0), %s1471_s16, 256, %s1475_s25, %s1478_s27, %s1731_s9, %s1731_s9, %s1733_s28  }
  0x3b   : > { %p1752_p8 = scmp.lt.s32.totalorder %s1340_s23, 3  ;;  %p1753_p9 = scmp.ge.s32.totalorder %s1340_s23, 1 }
  0x3c   : > { %s1523_s15 = scalar_lea.hbm %s1721_s0, %s1458_s11  ;;  %s243_s26 = scalar_lea.vmem [#allocation2], %s1455_s10 }
  0x3d   : > { %p1515_p11 = pnand %p1753_p9, %p1752_p8  ;;  %s253_s1 = sshll.u32 %s243_s26, 4  ;;  %s1526_s1 = int_to_ptr.vmem [resolvable:$true] %s253_s1 }
  0x3e   : > { %s1532_s9 = scalar_lea.hbm %s1723_s2, %s1458_s11  ;;  %s1755_s28 = sand.u32 1, %s1328_s20  }
  0x3f   : > { %s1754_s17 = scalar_select %p1515_p11, 1, 0 }
  0x40   : > { %s1536_s22 = scalar_lea.sflag [#allocation3], %s1755_s28  ;;  %s1162_s7 = scalar_lea.hbm %s1523_s15, 256 }
  0x41   : > { %p1163_p12 = scmp.ne.s32.totalorder %s1523_s15, %s1162_s7  ;;  %s1167_s23 = scalar_lea.hbm %s1721_s0, 512 }
  0x42   : > { %p1168_p6 = scmp.lt.u32.totalorder %s1523_s15, %s1721_s0  ;;  %p1169_p13 = scmp.lt.u32.totalorder %s1167_s23, %s1162_s7 }
  0x43   : > { %p1165_p1 = pnand %p1163_p12, %p1484_p4  ;;  %p1171_p5 = scmp.lt.u32.totalorder %s1162_s7, %s1523_s15 }
  0x44   : > { %p1170_p3 = por %p1169_p13, %p1168_p6 }
  0x45   : > { %p1166_p2 = pneg %p1165_p1 }
  0x46   : > { %p1172_p7 = por %p1171_p5, %p1170_p3 }
  0x48   : > { %p1173_p10 = pnand %p1172_p7, %p1166_p2 }
  0x4a   : > { %1176 = shalt.err (!%p1173_p10)
}
  0x4b   : > { %s1177_s11 = scalar_lea.vmem %s1526_s1, 256  ;;  %s1345_s28 = smov [#allocation2]  }
  0x4c   : > { %p1178_p8 = scmp.ne.s32.totalorder %s1526_s1, %s1177_s11  ;;  %s1182_s16 = sshll.u32 %s1345_s28, 4  ;;  %s1183_s16 = int_to_ptr.vmem [resolvable:$false] %s1182_s16 }
  0x4d   : > { %s1184_s8 = scalar_lea.vmem %s1183_s16, 512  ;;  %p1185_p1 = scmp.lt.s32.totalorder %s1526_s1, %s1183_s16 }
  0x4e   : > { %p1180_p9 = pnand %p1178_p8, %p1484_p4  ;;  %p1186_p11 = scmp.lt.s32.totalorder %s1184_s8, %s1177_s11 }
  0x50   : > { %p1181_p12 = pneg %p1180_p9  ;;  %p1187_p6 = por %p1186_p11, %p1185_p1 }
  0x52   : > { %p1188_p13 = pnand %p1187_p6, %p1181_p12 }
  0x54   : > { %1191 = shalt.err (!%p1188_p13)
}
  0x55   : > { %s1756_s23 = smov 8   ;;  %s1757_s7 = smov 128  }
  0x56   : > { %1053 = dma.hbm_to_vmem [thread:$0]  (!%p1462_p0), %s1523_s15, 256, %s1526_s1, %s1536_s22, %s1757_s7, %s1757_s7, %s1756_s23  }
  0x57   : > { %s290_s25 = scalar_lea.vmem [#allocation7], %s1455_s10  ;;  %s1192_s14 = scalar_lea.hbm %s1532_s9, 256 }
  0x58   : > { %s299_s13 = sshll.u32 %s290_s25, 4  ;;  %p1193_p11 = scmp.ne.s32.totalorder %s1532_s9, %s1192_s14  ;;  %s1564_s13 = int_to_ptr.vmem [resolvable:$true] %s299_s13 }
  0x59   : > { %s1197_s28 = scalar_lea.hbm %s1723_s2, 512  ;;  %p1198_p5 = scmp.lt.u32.totalorder %s1532_s9, %s1723_s2 }
  0x5a   : > { %p1195_p2 = pnand %p1193_p11, %p1484_p4  ;;  %p1199_p7 = scmp.lt.u32.totalorder %s1197_s28, %s1192_s14 }
  0x5b   : > { %p1201_p8 = scmp.lt.u32.totalorder %s1192_s14, %s1532_s9 }
  0x5c   : > { %p1196_p3 = pneg %p1195_p2  ;;  %p1200_p10 = por %p1199_p7, %p1198_p5 }
  0x5e   : > { %p1202_p9 = por %p1201_p8, %p1200_p10 }
  0x60   : > { %p1203_p12 = pnand %p1202_p9, %p1196_p3 }
  0x62   : > { %1206 = shalt.err (!%p1203_p12)
}
  0x63   : > { %s1207_s1 = scalar_lea.vmem %s1564_s13, 256  ;;  %s1346_s22 = smov [#allocation7]  }
  0x64   : > { %p1208_p1 = scmp.ne.s32.totalorder %s1564_s13, %s1207_s1  ;;  %s1212_s10 = sshll.u32 %s1346_s22, 4  ;;  %s1213_s10 = int_to_ptr.vmem [resolvable:$false] %s1212_s10 }
  0x65   : > { %s1214_s15 = scalar_lea.vmem %s1213_s10, 512  ;;  %p1215_p11 = scmp.lt.s32.totalorder %s1564_s13, %s1213_s10 }
  0x66   : > { %p1210_p6 = pnand %p1208_p1, %p1484_p4  ;;  %p1216_p2 = scmp.lt.s32.totalorder %s1214_s15, %s1207_s1 }
  0x68   : > { %p1211_p13 = pneg %p1210_p6  ;;  %p1217_p5 = por %p1216_p2, %p1215_p11 }
  0x6a   : > { %p1218_p7 = pnand %p1217_p5, %p1211_p13 }
  0x6c   : > { %1221 = shalt.err (!%p1218_p7)
}
  0x6d   : > { %1059 = dma.hbm_to_vmem [thread:$0]  (!%p1462_p0), %s1532_s9, 256, %s1564_s13, %s1478_s27, %s1757_s7, %s1757_s7, %s1756_s23  }
  0x6e   : > { %p1758_p4 = scmp.ne.s32.totalorder %s1754_s17, 0 }
  0x6f   : > { %s1594_s29 = sand.u32 (!%p1758_p4), 1, %s1324_s19   ;;  %p1759_p3 = scmp.ne.s32.totalorder (!%p1758_p4), %s1744_s30, 0 }
  0x70   : > { %321 = sbr.rel (%p1758_p4) target bundleno = 999 (0x3e7), region = 36  ;;  %s1597_s25 = sshll.u32 (!%p1758_p4), %s1594_s29, 4 }
  0x71   : > { %s324_s12 = scalar_lea.sflag (!%p1758_p4), [#allocation3], %s1594_s29  ;;  %s327_s14 = scalar_lea.vmem (!%p1758_p4), [#allocation2], %s1597_s25 }
  0x77   : > { %1303 = dma.done.wait (%p1759_p3), %s324_s12, 256  }
  0x78   : > { %1305 = vsyncadd (%p1759_p3), %s324_s12, 4294967040  ;;  %s332_s27 = sand.u32 1, %s1415_s24   ;;  %s336_s17 = scalar_lea.vmem [#allocation5], %s1597_s25 }
  0x79   : > { %s333_s9 = scalar_lea.sflag [#allocation6], %s332_s27 }
  0x7a   : > { %1307 = dma.done.wait (%p1759_p3), %s333_s9, 512  }
  0x7b   : > { %1309 = vsyncadd (%p1759_p3), %s333_s9, 4294966784  ;;  %v1347_v0 = vmov 0.0   ;;  %vm1348_vm0 = vmmov 0   ;;  %vm417_vm1 = vcmask 261120   ;;  %v408_v1 = vld [vmem:[%s336_s17 + $0x8] sm:$0xff]  ;;  %v407_v3 = vld [vmem:[%s336_s17] sm:$0xff] }
  0x7c   : > { %1025 = vmatprep.subr.mxu1 %v1347_v0  ;;  %1027 = vmatprep.mubr.msk.f32.mxu1 %vm1348_vm0, %v1347_v0  ;;  %v406_v2 = vld [vmem:[%s327_s14 + $0x8] sm:$0xff]  ;;  %v405_v5 = vld [vmem:[%s327_s14] sm:$0xff]  ;;  %p397_p0 = scmp.lt.s32.totalorder %s1332_s21, 1  ;;  %vm570_vm2 = vcmask 64512   ;;  %s345_s26 = scalar_lea.vmem [#allocation7], %s1597_s25 }
  0x7d   : > { %1020 = vmatprep.subr.mxu0 %v1347_v0  ;;  %1022 = vmatprep.mubr.msk.f32.mxu0 %vm1348_vm0, %v1347_v0  ;;  %v412_v4 = vmul.f32 0.17677669, %v406_v2  ;;  %v411_v6 = vmul.f32 0.17677669, %v405_v5  ;;  %v410_v29 = vld [vmem:[%s345_s26 + $0x8] sm:$0xff]  ;;  %v409_v30 = vld [vmem:[%s345_s26] sm:$0xff] }
  0x7e   : > { %1026 = vmatpush3.xpose.msk.msra.mxu1 %vm417_vm1, %v408_v1  ;;  %1021 = vmatpush3.xpose.msk.msra.mxu0 %vm417_vm1, %v407_v3  ;;  %s398_s24 = scalar_select %p397_p0, %s1332_s21, 1 }
  0x7f   : > { %1035 = vmatprep.subr.mxu1 %v1347_v0  ;;  %1030 = vmatprep.subr.mxu0 %v1347_v0  ;;  %s393_s11 = scalar_lea.vmem [#allocation9], %s1597_s25  ;;  %s1011_s28 = sshll.u32 %s1332_s21, 8 }
  0x80   : > { %s994_s30 = sshll.u32 %s398_s24, 2  ;;  %s785_s16 = sshll.u32 %s393_s11, 4  ;;  %s1640_s16 = int_to_ptr.vmem [resolvable:$true] %s785_s16 }
  0x81   : > { %1028 = vmatmul.mubr.msk.f32.vlgmr.msra.gmra.mrb[0].mxu1 %vm417_vm1, %v412_v4  ;;  %1023 = vmatmul.mubr.msk.f32.vlgmr.msra.gmra.mrb[0].mxu0 %vm417_vm1, %v411_v6  ;;  %s403_s13 = scalar_lea.vmem %s1724_s3, %s994_s30  ;;  %s1638_s22 = scalar_lea.hbm %s1726_s5, %s1011_s28 }
  0x82   : > { %1037 = vmatprep.mubr.msk.f32.mxu1 %vm1348_vm0, %v1347_v0  ;;  %1032 = vmatprep.mubr.msk.f32.mxu0 %vm1348_vm0, %v1347_v0  ;;  %v413_v7 = vld [vmem:[%s403_s13] sm:$0xf]  ;;  %s754_s10 = scalar_lea.sflag [#allocation10], %s1594_s29  ;;  %s1222_s15 = scalar_lea.vmem %s1640_s16, 256 }
  0x83   : > { %v414_v8 = vunpack.c.l.bf16 %v413_v7  ;;  %1036 = vmatpush3.msra.mxu1 %v410_v29  ;;  %1031 = vmatpush3.msra.mxu0 %v409_v30  ;;  %p1223_p10 = scmp.ne.s32.totalorder %s1640_s16, %s1222_s15  ;;  %p1760_p8 = scmp.ne.s32.totalorder %s1745_s6, 0 }
  0x84   : > { %s1349_s25 = smov [#allocation9]  }
  0x85   : > { %v415_v9 = vsub.f32 1.0, %v414_v8  ;;  %p1224_p9 = pnand %p1223_p10, %p1760_p8  ;;  %s1226_s12 = sshll.u32 %s1349_s25, 4  ;;  %s1227_s12 = int_to_ptr.vmem [resolvable:$false] %s1226_s12 }
  0x86   : > { %s1228_s14 = scalar_lea.vmem %s1227_s12, 512  ;;  %p1229_p1 = scmp.lt.s32.totalorder %s1640_s16, %s1227_s12 }
  0x87   : > { %v416_v10 = vmul.f32 -1e+09, %v415_v9  ;;  %p1225_p12 = pneg %p1224_p9  ;;  %p1230_p6 = scmp.lt.s32.totalorder %s1228_s14, %s1222_s15 }
  0x89   : > { %p1231_p13 = por %p1230_p6, %p1229_p1 }
  0x8b   : > { %p1232_p11 = pnand %p1231_p13, %p1225_p12 }
 0x154   : > { %v566_v11 = vpop.f32.mrb[0].mxu1  ;;  %v490_v12 = vpop.f32.mrb[0].mxu0 }
 0x155   : > { %v567_v13 = vadd.f32 %v566_v11, %v416_v10  ;;  %v1029_v14 = vpop.f32.mrb[1].mxu1  ;;  %v491_v15 = vadd.f32 %v490_v12, %v416_v10  ;;  %v1024_v16 = vpop.f32.mrb[1].mxu0 }
 0x157   : > { %v574_v17 = vsel %vm570_vm2, %v567_v13, -inf  ;;  %v571_v18 = vsel %vm570_vm2, %v491_v15, -inf }
 0x158   : > { %575 = vmax.xlane.f32.xlu0 %v574_v17 }
 0x15c   : > { %572 = vmax.xlane.f32.xlu0 %v571_v18 }
 0x1e5   : > { %v576_v19 = vpop.xlane.xlu0 %575 }
 0x1e6   : > { %v578_v20 = vsub.f32 %v567_v13, %v576_v19 }
 0x1e8   : > { %v581_v21 = vmul.f32 1.442695, %v578_v20 }
 0x1e9   : > { %v573_v22 = vpop.xlane.xlu0 %572 }
 0x1ea   : > { %1124 = vpow2.f32 %v581_v21  ;;  %v577_v23 = vsub.f32 %v491_v15, %v573_v22 }
 0x1ec   : > { %v579_v24 = vmul.f32 1.442695, %v577_v23 }
 0x1ee   : > { %1126 = vpow2.f32 %v579_v24 }
 0x1f4   : > { %v1125_v25 = vpop.eup %1124 }
 0x1f5   : > { %v586_v26 = vsel %vm570_vm2, %v1125_v25, 0.0 }
 0x1f6   : > { %587 = vadd.xlane.f32.xlu1 %v586_v26 }
 0x1f8   : > { %v1127_v27 = vpop.eup %1126 }
 0x1f9   : > { %v583_v28 = vsel %vm570_vm2, %v1127_v27, 0.0 }
 0x1fa   : > { %584 = vadd.xlane.f32.xlu1 %v583_v28 }
 0x283   : > { %v588_v31 = vpop.xlane.xlu1 %587 }
 0x284   : > { %1128 = vrcp.f32 %v588_v31 }
 0x287   : > { %v585_v32 = vpop.xlane.xlu1 %584 }
 0x288   : > { %1130 = vrcp.f32 %v585_v32 }
 0x28e   : > { %v1129_v33 = vpop.eup %1128 }
 0x28f   : > { %v592_v34 = vmul.f32 %v1129_v33, %v1125_v25 }
 0x291   : > { %1038 = vmatmul.mubr.msk.f32.vlgmr.msra.gmra.mrb[2].mxu1 %vm570_vm2, %v592_v34  ;;  %594 = vst.msk [vmem:[%s393_s11 + $0x8] sm:$0xff] %vm570_vm2, %v592_v34 }
 0x292   : > { %v1131_v35 = vpop.eup %1130 }
 0x293   : > { %v590_v36 = vmul.f32 %v1131_v35, %v1127_v27 }
 0x295   : > { %1033 = vmatmul.mubr.msk.f32.vlgmr.msra.gmra.mrb[2].mxu0 %vm570_vm2, %v590_v36  ;;  %593 = vst.msk [vmem:[%s393_s11] sm:$0xff] %vm570_vm2, %v590_v36 }
 0x296   : > { %1235 = shalt.err (!%p1232_p11)
}
 0x297   : > { %s1236_s27 = scalar_lea.hbm %s1638_s22, 256  ;;  %s1240_s24 = scalar_lea.hbm %s1726_s5, 512 }
 0x298   : > { %p1237_p2 = scmp.ne.s32.totalorder %s1638_s22, %s1236_s27  ;;  %p1241_p4 = scmp.lt.u32.totalorder %s1638_s22, %s1726_s5 }
 0x299   : > { %p1242_p3 = scmp.lt.u32.totalorder %s1240_s24, %s1236_s27  ;;  %p1244_p10 = scmp.lt.u32.totalorder %s1236_s27, %s1638_s22 }
 0x29a   : > { %p1238_p5 = pnand %p1237_p2, %p1760_p8 }
 0x29b   : > { %p1243_p0 = por %p1242_p3, %p1241_p4 }
 0x29c   : > { %p1239_p7 = pneg %p1238_p5 }
 0x29d   : > { %p1245_p9 = por %p1244_p10, %p1243_p0 }
 0x29f   : > { %p1246_p12 = pnand %p1245_p9, %p1239_p7 }
 0x2a1   : > { %1249 = shalt.err (!%p1246_p12)
}
 0x2a2   : > { %s1350_s7 = smov 128   ;;  %s1351_s13 = smov 8   ;;  %vm746_vm3 = vcmask 523264  }
 0x2a3   : > { %1047 = dma.vmem_to_hbm [thread:$0]  (%p1760_p8), %s1640_s16, 256, %s1638_s22, %s754_s10, %s1350_s7, %s1350_s7, %s1351_s13  }
 0x2a4   : > { %s1352_s26 = smov 32   ;;  %s992_s11 = sshll.u32 %s1594_s29, 3 }
 0x2a5   : > { %s1003_s28 = sshll.u32 %s1332_s21, 7  ;;  %s386_s8 = scalar_lea.vmem [#allocation8], %s992_s11 }
 0x2a6   : > { %s769_s1 = sshll.u32 %s386_s8, 4  ;;  %s1671_s12 = scalar_lea.hbm %s1725_s4, %s1003_s28  ;;  %s1673_s1 = int_to_ptr.vmem [resolvable:$true] %s769_s1 }
 0x2a7   : > { %s749_s16 = scalar_lea.sflag [#allocation4], %s1594_s29  ;;  %s1250_s22 = scalar_lea.vmem %s1673_s1, 128 }
 0x2a8   : > { %p1251_p1 = scmp.ne.s32.totalorder %s1673_s1, %s1250_s22  ;;  %s1353_s21 = smov [#allocation8]  }
 0x2a9   : > { %s1254_s10 = sshll.u32 %s1353_s21, 4  ;;  %s1255_s10 = int_to_ptr.vmem [resolvable:$false] %s1254_s10 }
 0x2aa   : > { %p1252_p6 = pnand %p1251_p1, %p1760_p8  ;;  %s1256_s14 = scalar_lea.vmem %s1255_s10, 256 }
 0x2ab   : > { %p1257_p11 = scmp.lt.s32.totalorder %s1673_s1, %s1255_s10  ;;  %p1258_p2 = scmp.lt.s32.totalorder %s1256_s14, %s1250_s22 }
 0x2ac   : > { %p1253_p13 = pneg %p1252_p6 }
 0x2ad   : > { %p1259_p5 = por %p1258_p2, %p1257_p11 }
 0x2af   : > { %p1260_p7 = pnand %p1259_p5, %p1253_p13 }
 0x364   : > { %v737_v37 = vpop.f32.mrb[2].mxu1 }
 0x365   : > { %v1039_v38 = vpop.f32.mrb[3].mxu1  ;;  %742 = vrot.lane.b32.xlu0 %v737_v37, %s1352_s26 }
 0x368   : > { %v664_v39 = vpop.f32.mrb[2].mxu0 }
 0x369   : > { %v1034_v40 = vpop.f32.mrb[3].mxu0 }
 0x3d7   : > { %v743_v41 = vpop.permute.xlu0 %742 }
 0x3d8   : > { %v745_v42 = vsel %vm417_vm1, %v664_v39, %v743_v41 }
 0x3d9   : > { %747 = vst.msk [vmem:[%s386_s8] sm:$0xff] %vm746_vm3, %v745_v42 }
 0x3da   : > { %1263 = shalt.err (!%p1260_p7)
}
 0x3db   : > { %s1264_s29 = scalar_lea.hbm %s1671_s12, 128  ;;  %s1268_s17 = scalar_lea.hbm %s1725_s4, 256 }
 0x3dc   : > { %p1265_p4 = scmp.ne.s32.totalorder %s1671_s12, %s1264_s29  ;;  %p1269_p10 = scmp.lt.u32.totalorder %s1671_s12, %s1725_s4 }
 0x3dd   : > { %p1270_p9 = scmp.lt.u32.totalorder %s1268_s17, %s1264_s29  ;;  %p1272_p1 = scmp.lt.u32.totalorder %s1264_s29, %s1671_s12 }
 0x3de   : > { %p1266_p3 = pnand %p1265_p4, %p1760_p8 }
 0x3df   : > { %p1271_p12 = por %p1270_p9, %p1269_p10 }
 0x3e0   : > { %p1267_p0 = pneg %p1266_p3 }
 0x3e1   : > { %p1273_p6 = por %p1272_p1, %p1271_p12 }
 0x3e3   : > { %p1274_p13 = pnand %p1273_p6, %p1267_p0 }
 0x3e5   : > { %1277 = shalt.err (!%p1274_p13)
}
 0x3e6   : > { %1046 = dma.vmem_to_hbm [thread:$0]  (%p1760_p8), %s1673_s1, 128, %s1671_s12, %s749_s16  }
 0x3e7 PF: > { %s1761_s23 = sld [smem:[#allocation19_spill]]  ;;  %s1762_s7 = sld [smem:[#allocation16_spill]] }
 0x3e8   : > { %s800_s13 = sand.u32 1, %s1320_s18  }
 0x3e9   : > { %s801_s26 = scalar_lea.sflag [#allocation4], %s800_s13 }
 0x3ed   : > { %p1763_p11 = scmp.ne.s32.totalorder %s1761_s23, 0  ;;  %p1764_p2 = scmp.ge.s32.totalorder %s1762_s7, 2 }
 0x3ef   : > { %p1061_p5 = pnand %p1764_p2, %p1763_p11 }
 0x3f1   : > { %1311 = dma.done.wait (!%p1061_p5), %s801_s26, 128  }
 0x3f2   : > { %1313 = vsyncadd (!%p1061_p5), %s801_s26, 4294967168  ;;  %s810_s11 = scalar_lea.sflag [#allocation10], %s800_s13 }
 0x3f3   : > { %1315 = dma.done.wait (!%p1061_p5), %s810_s11, 256  }
 0x3f4   : > { %1317 = vsyncadd (!%p1061_p5), %s810_s11, 4294967040  ;;  %s28_s23 = sadd.s32 1, %s1762_s7   ;;  %s1765_s6 = sld [smem:[#allocation18_spill]] }
 0x3f5   : > { %p25_p7 = scmp.ge.s32.totalorder %s28_s23, 4   ;;  %s1766_s21 = sld [smem:[#allocation15_spill]] }
 0x3f6   : > { %s1767_s22 = sld [smem:[#allocation17_spill]]  ;;  %s1768_s18 = smov %s1324_s19 }
 0x3f7   : > { %s1769_s19 = smov %s1328_s20  ;;  %27 = sbr.rel (!%p25_p7) target bundleno = 12 (0xc), region = 125 }
 0x3fa   : > { %s1770_s20 = smov %s1765_s6 }
 0x3fe   :  { %815 = vsyncpa [#allocation3], 1 }
 0x3ff   :  { %817 = vsyncpa [#allocation3 + $0x1], 1 }
 0x400   :  { %818 = vsyncpa [#allocation6], 1 }
 0x401   :  { %820 = vsyncpa [#allocation6 + $0x1], 1 }
 0x402   :  { %821 = vsyncpa [#allocation4], 1 }
 0x403   :  { %823 = vsyncpa [#allocation4 + $0x1], 1 }
 0x404   :  { %824 = vsyncpa [#allocation10], 1 }
 0x405   :  { %826 = vsyncpa [#allocation10 + $0x1], 1 }

</bundles_post_ra>
